<compile_context>
chip_gen: v7x
topology: tpu7x:2x2x1
jax: 0.10.0
libtpu: 0.0.40
codegen_flags: <defaults>
</compile_context>

<pallas_src>
import jax
import jax.numpy as jnp
from jax.experimental import pallas as pl
from jax.experimental.pallas import tpu as pltpu


# --------------------------------------------------------------------------
# Kernels
# --------------------------------------------------------------------------
def _densenet_compute(x_ref, w1_ref, b1_ref, w2x_ref, w2h_ref, b2_ref,
                      w3s_ref, w3h_ref):
    """Shared per-row-block body. Returns (h1, h2, pre3)."""
    x = x_ref[...]                       # (TN, 2)
    x0 = x[:, 0:1]                       # (TN, 1)
    x1 = x[:, 1:2]                       # (TN, 1)

    # ---- layer 1:  h1 = tanh(x @ w1 + b1)  (K=2 -> two VPU broadcast FMAs) ----
    pre1 = x0 * w1_ref[0:1, :] + x1 * w1_ref[1:2, :] + b1_ref[...]
    h1 = jnp.tanh(pre1)                  # (TN, hid)

    # ---- layer 2:  h2 = tanh(cat(x, h1) @ w2 + b2) ----
    # x-side as broadcast FMAs; h1-side is the single MXU dot of the kernel,
    # fed with only the nonzero (hid, hid) weight block.
    pre2 = (x0 * w2x_ref[0:1, :] + x1 * w2x_ref[1:2, :] + b2_ref[...]
            + jnp.dot(h1.astype(w2h_ref.dtype), w2h_ref[...],
                      preferred_element_type=jnp.float32))
    h2 = jnp.tanh(pre2)                  # (TN, hid)

    # ---- layer 3:  x4 = sigmoid(cat(x, h1, h2) @ w3 + b3) ----
    # Single output column -> VPU multiply + lane reduce (XLU), no MXU dot.
    c1 = jnp.sum(h1 * w3h_ref[0:1, :], axis=-1, keepdims=True)   # h1-side
    c2 = jnp.sum(h2 * w3h_ref[1:2, :], axis=-1, keepdims=True)   # h2-side
    pre3 = (x0 * w3s_ref[0:1, :] + x1 * w3s_ref[1:2, :]          # x-side
            + w3s_ref[2:3, :]                                    # b3
            + c1 + c2)                                           # (TN, 1)
    return h1, h2, pre3


def _densenet_kernel_full(x_ref, w1_ref, b1_ref, w2x_ref, w2h_ref, b2_ref,
                          w3s_ref, w3h_ref, x4_ref, h1_ref, h2_ref):
    h1, h2, pre3 = _densenet_compute(x_ref, w1_ref, b1_ref, w2x_ref, w2h_ref,
                                     b2_ref, w3s_ref, w3h_ref)
    h1_ref[...] = h1
    h2_ref[...] = h2
    x4_ref[...] = jax.nn.sigmoid(pre3)


def _densenet_kernel_x4(x_ref, w1_ref, b1_ref, w2x_ref, w2h_ref, b2_ref,
                        w3s_ref, w3h_ref, x4_ref):
    # Fast path: skip hidden-state writeback (~97% of the HBM write bytes).
    _, _, pre3 = _densenet_compute(x_ref, w1_ref, b1_ref, w2x_ref, w2h_ref,
                                   b2_ref, w3s_ref, w3h_ref)
    x4_ref[...] = jax.nn.sigmoid(pre3)


# --------------------------------------------------------------------------
# Wrapper
# --------------------------------------------------------------------------
_VMEM_BLOCK_BUDGET = 40 << 20   # bytes reserved for the double-buffered blocks


def _round_up(n, m):
    return ((n + m - 1) // m) * m


def _auto_block_rows(return_hidden):
    """Generation-aware default rows per grid step."""
    kind = ""
    try:
        kind = jax.devices()[0].device_kind.lower()
    except Exception:
        pass
    if "v5 lite" in kind or "v5e" in kind or "v5lite" in kind:
        base = 4096          # 16 MiB default scoped VMEM, ~0.8 TB/s HBM
    elif "v7" in kind:
        base = 8192          # 64 MiB physical VMEM/TC, ~3.2 TB/s HBM
    else:
        base = 8192          # v6e & default
    # x4-only path keeps ~half the VMEM per row -> amortize step overhead more.
    return base if return_hidden else 2 * base


def densenet_forward(x, params, *, block_rows=None, return_hidden=True,
                     use_bf16_dot=False):
    """x: (N, 2) float32.

    return_hidden=True  -> (x4 (N,1), hid1 (N,hid), hid2 (N,hid))  [torch parity]
    return_hidden=False -> x4 (N,1) only (drops hidden-state HBM writeback)

    block_rows: rows per grid step (multiple of 8); None -> generation-aware
    default.  For peak throughput pass N as a multiple of block_rows so the
    ragged-tail [:N] slice copies are skipped.
    use_bf16_dot: run the single (hid,hid) MXU dot in bf16 (≈3x fewer MXU
    passes, ~1e-3 abs error); default off to keep 1e-5 torch parity.
    """
    N = x.shape[0]
    hid = params["w1"].shape[1]

    # ---- split the dense-concat weights (tiny one-off ops; pre-pack in prod) ----
    w1, b1 = params["w1"], params["b1"]                    # (2,hid), (1,hid)
    w2, b2 = params["w2"], params["b2"]                    # (2+hid,hid), (1,hid)
    w3, b3 = params["w3"], params["b3"]                    # (2+2hid,1), (1,1)
    w2x, w2h = w2[:2], w2[2:]                              # (2,hid), (hid,hid)
    w3s = jnp.concatenate([w3[:2], jnp.reshape(b3, (1, 1))], axis=0)   # (3,1)
    w3h = jnp.stack([w3[2:2 + hid, 0], w3[2 + hid:, 0]], axis=0)        # (2,hid)
    if use_bf16_dot:
        w2h = w2h.astype(jnp.bfloat16)

    # ---- row tiling: narrow columns pad to 128 lanes in VMEM, so each
    # double-buffered block costs 1 KiB/row; budget accordingly. ----
    per_row_vmem = 2 * 128 * 4 * (4 if return_hidden else 2)
    if block_rows is None:
        block_rows = _auto_block_rows(return_hidden)
    tn_cap = ((_VMEM_BLOCK_BUDGET // per_row_vmem) // 8) * 8
    TN = max(8, min(_round_up(block_rows, 8), _round_up(N, 8), tn_cap))
    if _round_up(N, 8) <= TN and N >= 4096:
        # keep >= 2 grid steps so ("parallel",) can feed both TensorCores (v7x).
        TN = _round_up((N + 1) // 2, 8)
    N_pad = _round_up(N, TN)
    if N_pad != N:
        x = jnp.pad(x, ((0, N_pad - N), (0, 0)))

    grid = (N_pad // TN,)
    row_map = lambda i: (i, 0)
    const_map = lambda i: (0, 0)          # weights: VMEM-resident, DMA'd once

    in_specs = [
        pl.BlockSpec((TN, 2), row_map),
        pl.BlockSpec(w1.shape, const_map),
        pl.BlockSpec(b1.shape, const_map),
        pl.BlockSpec(w2x.shape, const_map),
        pl.BlockSpec(w2h.shape, const_map),
        pl.BlockSpec(b2.shape, const_map),
        pl.BlockSpec(w3s.shape, const_map),
        pl.BlockSpec(w3h.shape, const_map),
    ]
    vmem_limit = int(min(48 << 20, max(32 << 20, per_row_vmem * TN + (8 << 20))))
    cparams = pltpu.CompilerParams(dimension_semantics=("parallel",),
                                   vmem_limit_bytes=vmem_limit)
    args = (x, w1, b1, w2x, w2h, b2, w3s, w3h)

    if return_hidden:
        x4, h1, h2 = pl.pallas_call(
            _densenet_kernel_full,
            out_shape=(jax.ShapeDtypeStruct((N_pad, 1), jnp.float32),
                       jax.ShapeDtypeStruct((N_pad, hid), jnp.float32),
                       jax.ShapeDtypeStruct((N_pad, hid), jnp.float32)),
            grid=grid,
            in_specs=in_specs,
            out_specs=(pl.BlockSpec((TN, 1), row_map),
                       pl.BlockSpec((TN, hid), row_map),
                       pl.BlockSpec((TN, hid), row_map)),
            compiler_params=cparams,
        )(*args)
        if N_pad != N:    # ragged tail only; avoided when N % block_rows == 0
            x4, h1, h2 = x4[:N], h1[:N], h2[:N]
        return x4, h1, h2

    x4 = pl.pallas_call(
        _densenet_kernel_x4,
        out_shape=jax.ShapeDtypeStruct((N_pad, 1), jnp.float32),
        grid=grid,
        in_specs=in_specs,
        out_specs=pl.BlockSpec((TN, 1), row_map),
        compiler_params=cparams,
    )(*args)
    return x4[:N] if N_pad != N else x4


# --------------------------------------------------------------------------
# Init + plain-JAX reference (torch parity)
# --------------------------------------------------------------------------
def init_params(key, hid):
    """Deterministic init matching the torch module's Linear shapes
    (weights stored as (in_features, out_features))."""
    ks = jax.random.split(key, 6)

    def lin(kw, kb, fan_in, fan_out):
        bound = 1.0 / jnp.sqrt(fan_in)
        w = jax.random.uniform(kw, (fan_in, fan_out), jnp.float32, -bound, bound)
        b = jax.random.uniform(kb, (1, fan_out), jnp.float32, -bound, bound)
        return w, b

    w1, b1 = lin(ks[0], ks[1], 2, hid)
    w2, b2 = lin(ks[2], ks[3], 2 + hid, hid)
    w3, b3 = lin(ks[4], ks[5], 2 + 2 * hid, 1)
    return {"w1": w1, "b1": b1, "w2": w2, "b2": b2, "w3": w3, "b3": b3}


def densenet_reference(x, params):
    """Plain-JAX reference reproducing the torch forward exactly."""
    x1 = x
    x2 = jnp.tanh(x1 @ params["w1"] + params["b1"])
    x3 = jnp.tanh(jnp.concatenate((x1, x2), 1) @ params["w2"] + params["b2"])
    x4 = jax.nn.sigmoid(
        jnp.concatenate((x1, x2, x3), 1) @ params["w3"] + params["b3"])
    return x4, x2, x3


# --------------------------------------------------------------------------
if __name__ == "__main__":
    key = jax.random.PRNGKey(0)
    k_x, k_p = jax.random.split(key)

    HID = 32
    params = init_params(k_p, HID)

    # Small but non-trivial: multi-step grid and a ragged tail
    # (200 rows -> padded to 256 with 64-row tiles, grid of 4).
    N = 200
    x = jax.random.normal(k_x, (N, 2), jnp.float32)

    ref_out, ref_h1, ref_h2 = densenet_reference(x, params)

    # Full path (torch parity: x4 + both hidden activations).
    out, hid1, hid2 = densenet_forward(x, params, block_rows=64)
    jax.block_until_ready((out, hid1, hid2))
    assert out.shape == (N, 1)
    assert hid1.shape == (N, HID) and hid2.shape == (N, HID)
    assert jnp.allclose(out, ref_out, atol=1e-5, rtol=1e-5)
    assert jnp.allclose(hid1, ref_h1, atol=1e-5, rtol=1e-5)
    assert jnp.allclose(hid2, ref_h2, atol=1e-5, rtol=1e-5)

    # Auto (generation-aware) tile sizing.
    out_auto, h1a, h2a = densenet_forward(x, params)
    jax.block_until_ready((out_auto, h1a, h2a))
    assert jnp.allclose(out_auto, ref_out, atol=1e-5, rtol=1e-5)
    assert jnp.allclose(h1a, ref_h1, atol=1e-5, rtol=1e-5)

    # x4-only fast path (skips the hidden-activation writeback).
    x4_only = densenet_forward(x, params, block_rows=64, return_hidden=False)
    jax.block_until_ready(x4_only)
    assert jnp.allclose(x4_only, ref_out, atol=1e-5, rtol=1e-5)

    # Optional bf16 MXU-dot path (gated; looser tolerance, not torch-parity).
    x4_bf16, _, _ = densenet_forward(x, params, block_rows=64, use_bf16_dot=True)
    jax.block_until_ready(x4_bf16)
    assert jnp.allclose(x4_bf16, ref_out, atol=5e-2)

    print("KERNEL_OK")
</pallas_src>

<mosaic_0001>
module attributes {stable_mosaic.version = 11 : i64} {
  func.func @_densenet_kernel_full(%arg0: i32, %arg1: memref<64x2xf32, #tpu.memory_space<vmem>>, %arg2: memref<2x32xf32, #tpu.memory_space<vmem>>, %arg3: memref<1x32xf32, #tpu.memory_space<vmem>>, %arg4: memref<2x32xf32, #tpu.memory_space<vmem>>, %arg5: memref<32x32xf32, #tpu.memory_space<vmem>>, %arg6: memref<1x32xf32, #tpu.memory_space<vmem>>, %arg7: memref<3x1xf32, #tpu.memory_space<vmem>>, %arg8: memref<2x32xf32, #tpu.memory_space<vmem>>, %arg9: memref<64x1xf32, #tpu.memory_space<vmem>>, %arg10: memref<64x32xf32, #tpu.memory_space<vmem>>, %arg11: memref<64x32xf32, #tpu.memory_space<vmem>>) attributes {dimension_semantics = [#tpu.dimension_semantics<parallel>], iteration_bounds = array<i64: 4>, scalar_prefetch = 0 : i64, scratch_operands = 0 : i64, tpu.core_type = #tpu.core_type<tc>, window_params = [{transform_indices = @transform_0, window_bounds = array<i64: 64, 2>}, {pipeline_mode = #tpu.pipeline_mode<synchronous>, transform_indices = @transform_1, window_bounds = array<i64: 2, 32>}, {pipeline_mode = #tpu.pipeline_mode<synchronous>, transform_indices = @transform_2, window_bounds = array<i64: 1, 32>}, {pipeline_mode = #tpu.pipeline_mode<synchronous>, transform_indices = @transform_3, window_bounds = array<i64: 2, 32>}, {pipeline_mode = #tpu.pipeline_mode<synchronous>, transform_indices = @transform_4, window_bounds = array<i64: 32, 32>}, {pipeline_mode = #tpu.pipeline_mode<synchronous>, transform_indices = @transform_5, window_bounds = array<i64: 1, 32>}, {pipeline_mode = #tpu.pipeline_mode<synchronous>, transform_indices = @transform_6, window_bounds = array<i64: 3, 1>}, {pipeline_mode = #tpu.pipeline_mode<synchronous>, transform_indices = @transform_7, window_bounds = array<i64: 2, 32>}, {transform_indices = @transform_8, window_bounds = array<i64: 64, 1>}, {transform_indices = @transform_9, window_bounds = array<i64: 64, 32>}, {transform_indices = @transform_10, window_bounds = array<i64: 64, 32>}]} {
    %c0 = arith.constant 0 : index
    %c0_0 = arith.constant 0 : index
    %0 = vector.load %arg1[%c0, %c0_0] : memref<64x2xf32, #tpu.memory_space<vmem>>, vector<64x2xf32>
    %1 = vector.extract_strided_slice %0 {offsets = [0, 0], sizes = [64, 1], strides = [1, 1]} : vector<64x2xf32> to vector<64x1xf32>
    %2 = vector.extract_strided_slice %0 {offsets = [0, 1], sizes = [64, 1], strides = [1, 1]} : vector<64x2xf32> to vector<64x1xf32>
    %c0_1 = arith.constant 0 : index
    %c0_2 = arith.constant 0 : index
    %3 = vector.load %arg2[%c0_1, %c0_2] : memref<2x32xf32, #tpu.memory_space<vmem>>, vector<1x32xf32>
    %4 = vector.broadcast %1 : vector<64x1xf32> to vector<64x32xf32>
    %5 = vector.broadcast %3 : vector<1x32xf32> to vector<64x32xf32>
    %6 = arith.mulf %4, %5 : vector<64x32xf32>
    %c1 = arith.constant 1 : index
    %c0_3 = arith.constant 0 : index
    %7 = vector.load %arg2[%c1, %c0_3] : memref<2x32xf32, #tpu.memory_space<vmem>>, vector<1x32xf32>
    %8 = vector.broadcast %2 : vector<64x1xf32> to vector<64x32xf32>
    %9 = vector.broadcast %7 : vector<1x32xf32> to vector<64x32xf32>
    %10 = arith.mulf %8, %9 : vector<64x32xf32>
    %11 = arith.addf %6, %10 : vector<64x32xf32>
    %c0_4 = arith.constant 0 : index
    %c0_5 = arith.constant 0 : index
    %12 = vector.load %arg3[%c0_4, %c0_5] : memref<1x32xf32, #tpu.memory_space<vmem>>, vector<1x32xf32>
    %13 = vector.broadcast %12 : vector<1x32xf32> to vector<64x32xf32>
    %14 = arith.addf %11, %13 : vector<64x32xf32>
    %15 = math.tanh %14 : vector<64x32xf32>
    %c0_6 = arith.constant 0 : index
    %c0_7 = arith.constant 0 : index
    %16 = vector.load %arg4[%c0_6, %c0_7] : memref<2x32xf32, #tpu.memory_space<vmem>>, vector<1x32xf32>
    %17 = vector.broadcast %1 : vector<64x1xf32> to vector<64x32xf32>
    %18 = vector.broadcast %16 : vector<1x32xf32> to vector<64x32xf32>
    %19 = arith.mulf %17, %18 : vector<64x32xf32>
    %c1_8 = arith.constant 1 : index
    %c0_9 = arith.constant 0 : index
    %20 = vector.load %arg4[%c1_8, %c0_9] : memref<2x32xf32, #tpu.memory_space<vmem>>, vector<1x32xf32>
    %21 = vector.broadcast %2 : vector<64x1xf32> to vector<64x32xf32>
    %22 = vector.broadcast %20 : vector<1x32xf32> to vector<64x32xf32>
    %23 = arith.mulf %21, %22 : vector<64x32xf32>
    %24 = arith.addf %19, %23 : vector<64x32xf32>
    %c0_10 = arith.constant 0 : index
    %c0_11 = arith.constant 0 : index
    %25 = vector.load %arg6[%c0_10, %c0_11] : memref<1x32xf32, #tpu.memory_space<vmem>>, vector<1x32xf32>
    %26 = vector.broadcast %25 : vector<1x32xf32> to vector<64x32xf32>
    %27 = arith.addf %24, %26 : vector<64x32xf32>
    %c0_12 = arith.constant 0 : index
    %c0_13 = arith.constant 0 : index
    %28 = vector.load %arg5[%c0_12, %c0_13] : memref<32x32xf32, #tpu.memory_space<vmem>>, vector<32x32xf32>
    %cst = arith.constant dense<0.000000e+00> : vector<64x32xf32>
    %29 = tpu.matmul %15, %28, %cst {dimension_numbers = #tpu.dot_dimension_numbers<[1], [0], [0], [1], [0, 0, 1, 1], [], []>} : vector<64x32xf32>, vector<32x32xf32>, vector<64x32xf32> -> vector<64x32xf32>
    %30 = arith.addf %27, %29 : vector<64x32xf32>
    %31 = math.tanh %30 : vector<64x32xf32>
    %c0_14 = arith.constant 0 : index
    %c0_15 = arith.constant 0 : index
    %32 = vector.load %arg8[%c0_14, %c0_15] : memref<2x32xf32, #tpu.memory_space<vmem>>, vector<1x32xf32>
    %33 = vector.broadcast %32 : vector<1x32xf32> to vector<64x32xf32>
    %34 = arith.mulf %15, %33 : vector<64x32xf32>
    %cst_16 = arith.constant dense<0.000000e+00> : vector<64xf32>
    %35 = vector.multi_reduction <add>, %34, %cst_16 [1] : vector<64x32xf32> to vector<64xf32>
    %36 = vector.shape_cast %35 : vector<64xf32> to vector<64x1xf32>
    %c1_17 = arith.constant 1 : index
    %c0_18 = arith.constant 0 : index
    %37 = vector.load %arg8[%c1_17, %c0_18] : memref<2x32xf32, #tpu.memory_space<vmem>>, vector<1x32xf32>
    %38 = vector.broadcast %37 : vector<1x32xf32> to vector<64x32xf32>
    %39 = arith.mulf %31, %38 : vector<64x32xf32>
    %cst_19 = arith.constant dense<0.000000e+00> : vector<64xf32>
    %40 = vector.multi_reduction <add>, %39, %cst_19 [1] : vector<64x32xf32> to vector<64xf32>
    %41 = vector.shape_cast %40 : vector<64xf32> to vector<64x1xf32>
    %c0_20 = arith.constant 0 : index
    %c0_21 = arith.constant 0 : index
    %42 = vector.load %arg7[%c0_20, %c0_21] : memref<3x1xf32, #tpu.memory_space<vmem>>, vector<1x1xf32>
    %43 = vector.broadcast %42 : vector<1x1xf32> to vector<64x1xf32>
    %44 = arith.mulf %1, %43 : vector<64x1xf32>
    %c1_22 = arith.constant 1 : index
    %c0_23 = arith.constant 0 : index
    %45 = vector.load %arg7[%c1_22, %c0_23] : memref<3x1xf32, #tpu.memory_space<vmem>>, vector<1x1xf32>
    %46 = vector.broadcast %45 : vector<1x1xf32> to vector<64x1xf32>
    %47 = arith.mulf %2, %46 : vector<64x1xf32>
    %48 = arith.addf %44, %47 : vector<64x1xf32>
    %c2 = arith.constant 2 : index
    %c0_24 = arith.constant 0 : index
    %49 = vector.load %arg7[%c2, %c0_24] : memref<3x1xf32, #tpu.memory_space<vmem>>, vector<1x1xf32>
    %50 = vector.broadcast %49 : vector<1x1xf32> to vector<64x1xf32>
    %51 = arith.addf %48, %50 : vector<64x1xf32>
    %52 = arith.addf %51, %36 : vector<64x1xf32>
    %53 = arith.addf %52, %41 : vector<64x1xf32>
    %c0_25 = arith.constant 0 : index
    %c0_26 = arith.constant 0 : index
    %54 = vector.load %arg10[%c0_25, %c0_26] : memref<64x32xf32, #tpu.memory_space<vmem>>, vector<64x32xf32>
    tpu.vector_store %arg10[%c0_25, %c0_26], %15 {strides = array<i32>} : memref<64x32xf32, #tpu.memory_space<vmem>>, vector<64x32xf32>,
    %c0_27 = arith.constant 0 : index
    %c0_28 = arith.constant 0 : index
    %55 = vector.load %arg11[%c0_27, %c0_28] : memref<64x32xf32, #tpu.memory_space<vmem>>, vector<64x32xf32>
    tpu.vector_store %arg11[%c0_27, %c0_28], %31 {strides = array<i32>} : memref<64x32xf32, #tpu.memory_space<vmem>>, vector<64x32xf32>,
    %56 = arith.negf %53 : vector<64x1xf32>
    %57 = math.exp %56 : vector<64x1xf32>
    %cst_29 = arith.constant 1.000000e+00 : f32
    %58 = vector.broadcast %cst_29 : f32 to vector<64x1xf32>
    %59 = arith.addf %58, %57 : vector<64x1xf32>
    %60 = arith.divf %58, %59 : vector<64x1xf32>
    %c0_30 = arith.constant 0 : index
    %c0_31 = arith.constant 0 : index
    %61 = vector.load %arg9[%c0_30, %c0_31] : memref<64x1xf32, #tpu.memory_space<vmem>>, vector<64x1xf32>
    tpu.vector_store %arg9[%c0_30, %c0_31], %60 {strides = array<i32>} : memref<64x1xf32, #tpu.memory_space<vmem>>, vector<64x1xf32>,
    return
  }
  func.func @transform_0(%arg0: i32) -> (i32, i32) {
    %c0_i32 = arith.constant 0 : i32
    %c0_i32_0 = arith.constant 0 : i32
    return %arg0, %c0_i32 : i32, i32
  }
  func.func @transform_1(%arg0: i32) -> (i32, i32) {
    %c0_i32 = arith.constant 0 : i32
    %c0_i32_0 = arith.constant 0 : i32
    %c0_i32_1 = arith.constant 0 : i32
    return %c0_i32, %c0_i32_0 : i32, i32
  }
  func.func @transform_2(%arg0: i32) -> (i32, i32) {
    %c0_i32 = arith.constant 0 : i32
    %c0_i32_0 = arith.constant 0 : i32
    %c0_i32_1 = arith.constant 0 : i32
    return %c0_i32, %c0_i32_0 : i32, i32
  }
  func.func @transform_3(%arg0: i32) -> (i32, i32) {
    %c0_i32 = arith.constant 0 : i32
    %c0_i32_0 = arith.constant 0 : i32
    %c0_i32_1 = arith.constant 0 : i32
    return %c0_i32, %c0_i32_0 : i32, i32
  }
  func.func @transform_4(%arg0: i32) -> (i32, i32) {
    %c0_i32 = arith.constant 0 : i32
    %c0_i32_0 = arith.constant 0 : i32
    %c0_i32_1 = arith.constant 0 : i32
    return %c0_i32, %c0_i32_0 : i32, i32
  }
  func.func @transform_5(%arg0: i32) -> (i32, i32) {
    %c0_i32 = arith.constant 0 : i32
    %c0_i32_0 = arith.constant 0 : i32
    %c0_i32_1 = arith.constant 0 : i32
    return %c0_i32, %c0_i32_0 : i32, i32
  }
  func.func @transform_6(%arg0: i32) -> (i32, i32) {
    %c0_i32 = arith.constant 0 : i32
    %c0_i32_0 = arith.constant 0 : i32
    %c0_i32_1 = arith.constant 0 : i32
    return %c0_i32, %c0_i32_0 : i32, i32
  }
  func.func @transform_7(%arg0: i32) -> (i32, i32) {
    %c0_i32 = arith.constant 0 : i32
    %c0_i32_0 = arith.constant 0 : i32
    %c0_i32_1 = arith.constant 0 : i32
    return %c0_i32, %c0_i32_0 : i32, i32
  }
  func.func @transform_8(%arg0: i32) -> (i32, i32) {
    %c0_i32 = arith.constant 0 : i32
    %c0_i32_0 = arith.constant 0 : i32
    return %arg0, %c0_i32 : i32, i32
  }
  func.func @transform_9(%arg0: i32) -> (i32, i32) {
    %c0_i32 = arith.constant 0 : i32
    %c0_i32_0 = arith.constant 0 : i32
    return %arg0, %c0_i32 : i32, i32
  }
  func.func @transform_10(%arg0: i32) -> (i32, i32) {
    %c0_i32 = arith.constant 0 : i32
    %c0_i32_0 = arith.constant 0 : i32
    return %arg0, %c0_i32 : i32, i32
  }
}

</mosaic_0001>

<bundles_post_ra>
// kernel: tpu_custom_call.1
= control target key start
LH: loop header
LB: loop body
LE: loop exit
PB: predicated region body
PF: predicated region fallthrough
CT: control target
= control target key end

     0   :  { %s1334_s13 = smov 0   ;;  %s1677_s0 = inlined_call_operand.vmem [shape: f32[256,2], index: 0, kind: input, shape index: {}]   ;;  %s1678_s1 = inlined_call_operand.vmem [shape: f32[2,32], index: 1, kind: input, shape index: {}]   ;;  %s1679_s2 = inlined_call_operand.vmem [shape: f32[1,32], index: 2, kind: input, shape index: {}]   ;;  %s1680_s3 = inlined_call_operand.vmem [shape: f32[2,32], index: 3, kind: input, shape index: {}]   ;;  %s1681_s4 = inlined_call_operand.vmem [shape: f32[32,32], index: 4, kind: input, shape index: {}]   ;;  %s1682_s5 = inlined_call_operand.vmem [shape: f32[1,32], index: 5, kind: input, shape index: {}]   ;;  %s1683_s6 = inlined_call_operand.vmem [shape: f32[3,1], index: 6, kind: input, shape index: {}]   ;;  %s1684_s7 = inlined_call_operand.vmem [shape: f32[2,32], index: 7, kind: input, shape index: {}]   ;;  %s1685_s8 = inlined_call_operand.vmem [shape: f32[256,1], index: 8, kind: output, shape index: {0}]   ;;  %s1686_s9 = inlined_call_operand.vmem [shape: f32[256,32], index: 9, kind: output, shape index: {1}]   ;;  %s1687_s10 = inlined_call_operand.vmem [shape: f32[256,32], index: 10, kind: output, shape index: {2}]  }
   0x1 LB: > { %s1096_s14 = sadd.s32 4294967295, %s1273_s13   ;;  %p1100_p0 = scmp.ge.s32.totalorder %s1273_s13, 1  ;;  %s1273_s13 = sphi %s1334_s13, %s21_s13  }
   0x2   : > { %p318_p1 = scmp.lt.s32.totalorder %s1273_s13, 5 }
   0x4   : > { %p319_p2 = pnand %p1100_p0, %p318_p1 }
   0x5   : > { %s1101_s15 = sshll.u32 (!%p319_p2), %s1096_s14, 3  ;;  %v1275_v0 = vmov (!%p319_p2), 1   ;;  %v1276_v1 = vmov (!%p319_p2), 0   ;;  %v576_v9 = vld [vmem:[%s1681_s4] sm:$0xff] (!%p319_p2)  ;;  %v577_v10 = vld [vmem:[%s1681_s4 + $0x8] sm:$0xff] (!%p319_p2)  ;;  %v578_v12 = vld [vmem:[%s1681_s4 + $0x10] sm:$0xff] (!%p319_p2) }
   0x6   : > { %322 = sbr.rel (%p319_p2) target bundleno = 610 (0x262), region = 52  ;;  %1195 = vset.pattern.permute.xlu1 (!%p319_p2), %v1275_v0  ;;  %1194 = vset.pattern.permute.xlu0 (!%p319_p2), %v1276_v1  ;;  %p367_p3 = scmp.lt.s32.totalorder (!%p319_p2), %s1101_s15, 31  ;;  %v1170_v11 = vpack.c.bf16 (!%p319_p2), %v577_v10, %v576_v9  ;;  %v579_v13 = vld [vmem:[%s1681_s4 + $0x18] sm:$0xff] (!%p319_p2)  ;;  %v1126_v16 = vld [vmem:[%s1683_s6 + $0x1] ss:$0 sm:$0xff] (!%p319_p2)  ;;  %vm580_vm0 = vcmask (!%p319_p2), 261120  }
   0x7   : > { %v1174_v14 = vpack.c.bf16 (!%p319_p2), %v579_v13, %v578_v12  ;;  %s1277_s30 = smov (!%p319_p2), 1   ;;  %v1408_v17 = vld [vmem:[%s1678_s1 + $0x1] ss:$0 sm:$0xff] (!%p319_p2)  ;;  %v1418_v19 = vld [vmem:[%s1678_s1] ss:$0 sm:$0xff] (!%p319_p2)  ;;  %s1278_s26 = smov (!%p319_p2), 127  }
   0x8   : > { %1178 = vmatprep.subr.bf16.mxu1 (!%p319_p2), %v1170_v11  ;;  %1171 = vmatprep.subr.bf16.mxu0 (!%p319_p2), %v1170_v11  ;;  %v1413_v18 = vld [vmem:[%s1680_s3 + $0x1] ss:$0 sm:$0xff] (!%p319_p2)  ;;  %v1423_v20 = vld [vmem:[%s1680_s3] ss:$0 sm:$0xff] (!%p319_p2)  ;;  %vm963_vm1 = vcmask (!%p319_p2), 7168  }
   0x9   : > { %1180 = vmatpush3.bf16.msra.mxu1 (!%p319_p2), %v1170_v11  ;;  %1173 = vmatpush3.bf16.msra.mxu0 (!%p319_p2), %v1170_v11  ;;  %v1432_v27 = vld [vmem:[%s1679_s2] ss:$0 sm:$0xff] (!%p319_p2) }
   0xa   : > { %1179 = vmatprep.subr.bf16.mxu1 (!%p319_p2), %v1174_v14  ;;  %1175 = vmatprep.subr.bf16.mxu0 (!%p319_p2), %v1174_v14 }
   0xd   : > { %s1689_s15 = smov (!%p367_p3, %s1101_s15), 31  ;;  %1181 = vmatpush3.bf16.msra.mxu1 %v1174_v14  ;;  %1177 = vmatpush3.bf16.msra.mxu0 %v1174_v14 }
   0xe   : > { %s1342_s16 = sshll.u32 %s1689_s15, 3 }
   0xf   : > { %s1348_s19 = scalar_lea.vmem %s1677_s0, %s1342_s16  ;;  %s1448_s25 = scalar_lea.vmem %s1686_s9, %s1342_s16 }
  0x10   : > { %v1351_v2 = vld [vmem:[%s1348_s19] sm:$0xff]  ;;  %v1361_v4 = vld [vmem:[%s1348_s19 + $0x8] sm:$0xff]  ;;  %v1369_v6 = vld [vmem:[%s1348_s19 + $0x30] sm:$0xff]  ;;  %s1574_s14 = scalar_lea.vmem %s1687_s10, %s1342_s16  ;;  %s1654_s24 = scalar_lea.vmem %s1685_s8, %s1342_s16 }
  0x11   : > { %453 = vperm.xlu1 %1195, %v1351_v2   ;;  %401 = vperm.xlu0 %1194, %v1351_v2   ;;  %v1356_v3 = vld [vmem:[%s1348_s19 + $0x20] sm:$0xff]  ;;  %v1364_v5 = vld [vmem:[%s1348_s19 + $0x28] sm:$0xff]  ;;  %v1373_v7 = vld [vmem:[%s1348_s19 + $0x18] sm:$0xff] }
  0x12   : > { %v1378_v8 = vld [vmem:[%s1348_s19 + $0x10] sm:$0xff]  ;;  %v1398_v15 = vld [vmem:[%s1348_s19 + $0x38] sm:$0xff] }
  0x15   : > { %469 = vperm.xlu1 %1195, %v1356_v3   ;;  %421 = vperm.xlu0 %1194, %v1356_v3  }
  0x19   : > { %1196 = vset.pattern.permute.xlu1 %v1276_v1  ;;  %406 = vperm.xlu0 %1194, %v1361_v4  }
  0x1a   : > { %426 = vperm.xlu1 %1196, %v1364_v5  }
  0x1d   : > { %431 = vperm.xlu0 %1194, %v1369_v6  }
  0x1e   : > { %1197 = vset.pattern.permute.xlu1 %v1275_v0 }
  0x1f   : > { %473 = vperm.xlu1 %1197, %v1364_v5  }
  0x21   : > { %416 = vperm.xlu0 %1194, %v1373_v7  }
  0x23   : > { %1198 = vset.pattern.permute.xlu1 %v1276_v1 }
  0x24   : > { %411 = vperm.xlu1 %1198, %v1378_v8  }
  0x25   : > { %1200 = vset.pattern.permute.xlu0 %v1275_v0 }
  0x26   : > { %457 = vperm.xlu0 %1200, %v1361_v4  }
  0x28   : > { %1199 = vset.pattern.permute.xlu1 %v1275_v0 }
  0x29   : > { %461 = vperm.xlu1 %1199, %v1378_v8  }
  0x2a   : > { %465 = vperm.xlu0 %1200, %v1373_v7  }
  0x2d   : > { %477 = vperm.xlu1 %1199, %v1369_v6  }
  0x31   : > { %1201 = vset.pattern.permute.xlu1 %v1276_v1 }
  0x32   : > { %436 = vperm.xlu1 %1201, %v1398_v15  }
  0x36   : > { %1202 = vset.pattern.permute.xlu1 %v1275_v0 }
  0x37   : > { %481 = vperm.xlu1 %1202, %v1398_v15  }
  0x3b   : > { %819 = vrot.lane.b32.xlu1 %v1126_v16, %s1277_s30 }
  0x90   : > { %v454_v21 = vpop.permute.xlu1 %453  ;;  %v402_v22 = vpop.permute.xlu0 %401 }
  0x91   : > { %v488_v23 = vmul.f32 %v1408_v17, %v454_v21  ;;  %v545_v24 = vmul.f32 %v1413_v18, %v454_v21  ;;  %v443_v25 = vmul.f32 %v1418_v19, %v402_v22  ;;  %v532_v26 = vmul.f32 %v1423_v20, %v402_v22 }
  0x93   : > { %v496_v28 = vadd.f32 %v488_v23, %v443_v25  ;;  %v1434_v29 = vadd.f32 %v545_v24, %v532_v26 }
  0x94   : > { %v470_v30 = vpop.permute.xlu1 %469  ;;  %v422_v31 = vpop.permute.xlu0 %421 }
  0x95   : > { %v511_v32 = vadd.f32 %v1432_v27, %v496_v28  ;;  %v492_v33 = vmul.f32 %v1408_v17, %v470_v30  ;;  %v549_v34 = vmul.f32 %v1413_v18, %v470_v30  ;;  %v447_v35 = vmul.f32 %v1418_v19, %v422_v31 }
  0x96   : > { %v536_v36 = vmul.f32 %v1423_v20, %v422_v31 }
  0x97   : > { %1203 = vtanh.f32 %v511_v32  ;;  %v500_v37 = vadd.f32 %v492_v33, %v447_v35 }
  0x98   : > { %v1441_v38 = vadd.f32 %v549_v34, %v536_v36  ;;  %v407_v39 = vpop.permute.xlu0 %406 }
  0x99   : > { %v515_v40 = vadd.f32 %v1432_v27, %v500_v37  ;;  %v427_v41 = vpop.permute.xlu1 %426  ;;  %v444_v56 = vmul.f32 %v1418_v19, %v407_v39  ;;  %v533_v57 = vmul.f32 %v1423_v20, %v407_v39 }
  0x9a   : > { %v448_v44 = vmul.f32 %v1418_v19, %v427_v41  ;;  %v537_v45 = vmul.f32 %v1423_v20, %v427_v41 }
  0x9b   : > { %1205 = vtanh.f32 %v515_v40 }
  0x9c   : > { %v432_v42 = vpop.permute.xlu0 %431 }
  0x9d   : > { %v449_v21 = vmul.f32 %v1418_v19, %v432_v42  ;;  %v538_v24 = vmul.f32 %v1423_v20, %v432_v42 }
  0x9e   : > { %v474_v43 = vpop.permute.xlu1 %473 }
  0x9f   : > { %v493_v46 = vmul.f32 %v1408_v17, %v474_v43  ;;  %v550_v47 = vmul.f32 %v1413_v18, %v474_v43 }
  0xa0   : > { %v1454_v48 = vpop.permute.xlu0 %416 }
  0xa1   : > { %v1456_v49 = vpop.eup %1203  ;;  %v501_v50 = vadd.f32 %v493_v46, %v448_v44  ;;  %v1458_v51 = vadd.f32 %v550_v47, %v537_v45  ;;  %v446_v11 = vmul.f32 %v1418_v19, %v1454_v48 }
  0xa2   : > { %899 = vst.msk [vmem:[%s1448_s25] sm:$0xff] %vm580_vm0, %v1456_v49  ;;  %1158 = vmatprep.mubr.msk.f32.mxu0 %vm580_vm0, %v1456_v49 }
  0xa3   : > { %v516_v52 = vadd.f32 %v1432_v27, %v501_v50  ;;  %v412_v53 = vpop.permute.xlu1 %411 }
  0xa4   : > { %v445_v63 = vmul.f32 %v1418_v19, %v412_v53  ;;  %v534_v0 = vmul.f32 %v1423_v20, %v412_v53 }
  0xa5   : > { %v1466_v54 = vpop.eup %1205  ;;  %1207 = vtanh.f32 %v516_v52  ;;  %v458_v55 = vpop.permute.xlu0 %457 }
  0xa6   : > { %903 = vst.msk [vmem:[%s1448_s25 + $0x20] sm:$0xff] %vm580_vm0, %v1466_v54  ;;  %v489_v58 = vmul.f32 %v1408_v17, %v458_v55  ;;  %v546_v59 = vmul.f32 %v1413_v18, %v458_v55  ;;  %1164 = vmatprep.mubr.msk.f32.mxu1 %vm580_vm0, %v1466_v54 }
  0xa8   : > { %v497_v60 = vadd.f32 %v489_v58, %v444_v56  ;;  %v1477_v61 = vadd.f32 %v546_v59, %v533_v57  ;;  %v462_v62 = vpop.permute.xlu1 %461  ;;  %v1123_v58 = vld [vmem:[%s1684_s7] ss:$0 sm:$0xff] }
  0xa9   : > { %v490_v1 = vmul.f32 %v1408_v17, %v462_v62  ;;  %v547_v9 = vmul.f32 %v1413_v18, %v462_v62  ;;  %v1483_v10 = vpop.permute.xlu0 %465  ;;  %v731_v59 = vmul.f32 %v1456_v49, %v1123_v58  ;;  %v735_v49 = vmul.f32 %v1466_v54, %v1123_v58 }
  0xaa   : > { %v512_v12 = vadd.f32 %v1432_v27, %v497_v60  ;;  %v491_v13 = vmul.f32 %v1408_v17, %v1483_v10 }
  0xab   : > { %v498_v14 = vadd.f32 %v490_v1, %v445_v63  ;;  %v1490_v16 = vadd.f32 %v547_v9, %v534_v0  ;;  %v739_v60 = vsel %vm580_vm0, %v731_v59, 0.0 }
  0xac   : > { %1209 = vtanh.f32 %v512_v12  ;;  %v499_v22 = vadd.f32 %v491_v13, %v446_v11  ;;  %v478_v23 = vpop.permute.xlu1 %477 }
  0xad   : > { %v513_v25 = vadd.f32 %v1432_v27, %v498_v14  ;;  %v494_v26 = vmul.f32 %v1408_v17, %v478_v23  ;;  %v551_v28 = vmul.f32 %v1413_v18, %v478_v23 }
  0xae   : > { %v514_v30 = vadd.f32 %v1432_v27, %v499_v22  ;;  %v751_v22 = vsel %vm580_vm0, %v735_v49, 0.0 }
  0xaf   : > { %v1208_v31 = vpop.eup %1207  ;;  %1211 = vtanh.f32 %v513_v25  ;;  %v502_v32 = vadd.f32 %v494_v26, %v449_v21  ;;  %v1498_v33 = vadd.f32 %v551_v28, %v538_v24  ;;  %v1114_v25 = vld [vmem:[%s1682_s5] ss:$0 sm:$0xff] }
  0xb0   : > { %904 = vst.msk [vmem:[%s1448_s25 + $0x28] sm:$0xff] %vm580_vm0, %v1208_v31  ;;  %1213 = vtanh.f32 %v514_v30  ;;  %1165 = vmatmul.mubr.msk.f32.vlgmr.msra.gmra.mrb[0].mxu1 %vm580_vm0, %v1208_v31  ;;  %v736_v9 = vmul.f32 %v1208_v31, %v1123_v58  ;;  %v573_v26 = vadd.f32 %v1114_v25, %v1458_v51  ;;  %v572_v54 = vadd.f32 %v1114_v25, %v1441_v38 }
  0xb1   : > { %v517_v34 = vadd.f32 %v1432_v27, %v502_v32  ;;  %v437_v35 = vpop.permute.xlu1 %436  ;;  %v548_v32 = vmul.f32 %v1413_v18, %v1483_v10  ;;  %v568_v51 = vadd.f32 %v1114_v25, %v1434_v29 }
  0xb2   : > { %v450_v39 = vmul.f32 %v1418_v19, %v437_v35  ;;  %v539_v40 = vmul.f32 %v1423_v20, %v437_v35  ;;  %v754_v12 = vsel %vm580_vm0, %v736_v9, 0.0  ;;  %v535_v35 = vmul.f32 %v1423_v20, %v1454_v48 }
  0xb3   : > { %1215 = vtanh.f32 %v517_v34  ;;  %v570_v20 = vadd.f32 %v1114_v25, %v1490_v16 }
  0xb6   : > { %v1210_v36 = vpop.eup %1209  ;;  %v482_v37 = vpop.permute.xlu1 %481 }
  0xb7   : > { %900 = vst.msk [vmem:[%s1448_s25 + $0x8] sm:$0xff] %vm580_vm0, %v1210_v36  ;;  %v495_v41 = vmul.f32 %v1408_v17, %v482_v37  ;;  %v552_v42 = vmul.f32 %v1413_v18, %v482_v37  ;;  %1159 = vmatmul.mubr.msk.f32.vlgmr.msra.gmra.mrb[0].mxu0 %vm580_vm0, %v1210_v36  ;;  %v732_v11 = vmul.f32 %v1210_v36, %v1123_v58 }
  0xb8   : > { %v556_v36 = vadd.f32 %v548_v32, %v535_v35  ;;  %v569_v37 = vadd.f32 %v1114_v25, %v1477_v61 }
  0xb9   : > { %v1212_v43 = vpop.eup %1211  ;;  %v503_v44 = vadd.f32 %v495_v41, %v450_v39  ;;  %v1511_v45 = vadd.f32 %v552_v42, %v539_v40  ;;  %v742_v14 = vsel %vm580_vm0, %v732_v11, 0.0 }
  0xba   : > { %v1214_v46 = vpop.eup %1213  ;;  %901 = vst.msk [vmem:[%s1448_s25 + $0x10] sm:$0xff] %vm580_vm0, %v1212_v43  ;;  %v1515_v47 = vpop.permute.xlu1 %819  ;;  %1161 = vmatprep.mubr.msk.f32.mxu0 %vm580_vm0, %v1212_v43  ;;  %v733_v62 = vmul.f32 %v1212_v43, %v1123_v58  ;;  %v571_v42 = vadd.f32 %v1114_v25, %v556_v36  ;;  %v1615_v36 = vld [vmem:[%s1683_s6] ss:$0 sm:$0xff] }
  0xbb   : > { %902 = vst.msk [vmem:[%s1448_s25 + $0x18] sm:$0xff] %vm580_vm0, %v1214_v46  ;;  %v518_v17 = vadd.f32 %v1432_v27, %v503_v44  ;;  %1162 = vmatmul.mubr.msk.f32.gmra.mrb[2].mxu0 %vm580_vm0, %v1214_v46  ;;  %v822_v19 = vmul.f32 %v1515_v47, %v1351_v2  ;;  %v823_v50 = vmul.f32 %v1515_v47, %v1361_v4 }
  0xbc   : > { %v824_v53 = vmul.f32 %v1515_v47, %v1378_v8  ;;  %v826_v27 = vmul.f32 %v1515_v47, %v1356_v3  ;;  %v825_v55 = vmul.f32 %v1515_v47, %v1373_v7  ;;  %v827_v56 = vmul.f32 %v1515_v47, %v1364_v5 }
  0xbd   : > { %v1216_v52 = vpop.eup %1215  ;;  %1217 = vtanh.f32 %v518_v17  ;;  %838 = vrot.lane.b32.xlu1 %v822_v19, %s1278_s26  ;;  %840 = vrot.lane.b32.xlu0 %v823_v50, %s1278_s26  ;;  %v745_v63 = vsel %vm580_vm0, %v733_v62, 0.0  ;;  %v734_v0 = vmul.f32 %v1214_v46, %v1123_v58  ;;  %v1124_v46 = vld [vmem:[%s1684_s7 + $0x1] ss:$0 sm:$0xff]  ;;  %v575_v50 = vadd.f32 %v1114_v25, %v1511_v45 }
  0xbe   : > { %905 = vst.msk [vmem:[%s1448_s25 + $0x30] sm:$0xff] %vm580_vm0, %v1216_v52  ;;  %1167 = vmatprep.mubr.msk.f32.mxu1 %vm580_vm0, %v1216_v52  ;;  %v737_v23 = vmul.f32 %v1216_v52, %v1123_v58 }
  0xbf   : > { %v748_v1 = vsel %vm580_vm0, %v734_v0, 0.0 }
  0xc0   : > { %v757_v24 = vsel %vm580_vm0, %v737_v23, 0.0  ;;  %v829_v23 = vmul.f32 %v1515_v47, %v1398_v15 }
  0xc1   : > { %842 = vrot.lane.b32.xlu1 %v824_v53, %s1278_s26  ;;  %846 = vrot.lane.b32.xlu0 %v826_v27, %s1278_s26 }
  0xc5   : > { %844 = vrot.lane.b32.xlu1 %v825_v55, %s1278_s26 }
  0xc7   : > { %v1218_v57 = vpop.eup %1217 }
  0xc8   : > { %906 = vst.msk [vmem:[%s1448_s25 + $0x38] sm:$0xff] %vm580_vm0, %v1218_v57  ;;  %1168 = vmatmul.mubr.msk.f32.gmra.mrb[2].mxu1 %vm580_vm0, %v1218_v57  ;;  %v738_v13 = vmul.f32 %v1218_v57, %v1123_v58 }
  0xc9   : > { %848 = vrot.lane.b32.xlu1 %v827_v56, %s1278_s26  ;;  %v574_v56 = vadd.f32 %v1114_v25, %v1498_v33 }
  0xca   : > { %v760_v21 = vsel %vm580_vm0, %v738_v13, 0.0 }
  0xe0   : > { %740 = vadd.xlane.f32.xlu0 %v739_v60 }
  0xe4   : > { %746 = vadd.xlane.f32.xlu0 %v745_v63 }
  0xe8   : > { %749 = vadd.xlane.f32.xlu0 %v748_v1 }
  0xec   : > { %755 = vadd.xlane.f32.xlu0 %v754_v12 }
  0xed   : > { %743 = vadd.xlane.f32.xlu1 %v742_v14 }
  0xf0   : > { %761 = vadd.xlane.f32.xlu0 %v760_v21 }
  0xf1   : > { %752 = vadd.xlane.f32.xlu1 %v751_v22 }
  0xf5   : > { %758 = vadd.xlane.f32.xlu1 %v757_v24  ;;  %v828_v24 = vmul.f32 %v1515_v47, %v1369_v6  ;;  %v806_v47 = vmul.f32 %v1615_v36, %v1361_v4  ;;  %v808_v4 = vmul.f32 %v1615_v36, %v1373_v7 }
 0x12f   : > { %v841_v25 = vpop.permute.xlu0 %840 }
 0x183   : > { %v1166_v28 = vpop.f32.mrb[0].mxu1 }
 0x184   : > { %v715_v30 = vadd.f32 %v1166_v28, %v573_v26  ;;  %v691_v31 = vpop.f32.mrb[1].mxu1  ;;  %v839_v26 = vpop.permute.xlu1 %838 }
 0x185   : > { %v714_v34 = vadd.f32 %v691_v31, %v572_v54  ;;  %v847_v28 = vpop.permute.xlu0 %846 }
 0x186   : > { %1219 = vtanh.f32 %v715_v30 }
 0x187   : > { %1221 = vtanh.f32 %v714_v34 }
 0x188   : > { %v843_v54 = vpop.permute.xlu1 %842 }
 0x189   : > { %v741_v30 = vpop.xlane.xlu0 %740 }
 0x18a   : > { %v1160_v39 = vpop.f32.mrb[0].mxu0 }
 0x18b   : > { %v711_v40 = vadd.f32 %v1160_v39, %v569_v37  ;;  %v671_v38 = vpop.f32.mrb[1].mxu0  ;;  %v805_v39 = vmul.f32 %v1615_v36, %v1351_v2 }
 0x18c   : > { %v710_v41 = vadd.f32 %v671_v38, %v568_v51  ;;  %v845_v31 = vpop.permute.xlu1 %844  ;;  %v810_v38 = vmul.f32 %v1615_v36, %v1364_v5  ;;  %v807_v5 = vmul.f32 %v1615_v36, %v1378_v8 }
 0x18d   : > { %1223 = vtanh.f32 %v711_v40  ;;  %v747_v32 = vpop.xlane.xlu0 %746  ;;  %v863_v40 = vadd.f32 %v841_v25, %v806_v47 }
 0x18e   : > { %1225 = vtanh.f32 %v710_v41  ;;  %v1163_v18 = vpop.f32.mrb[2].mxu0 }
 0x18f   : > { %v713_v48 = vadd.f32 %v1163_v18, %v571_v42  ;;  %v681_v29 = vpop.f32.mrb[3].mxu0  ;;  %v862_v42 = vadd.f32 %v839_v26, %v805_v39  ;;  %v809_v18 = vmul.f32 %v1615_v36, %v1356_v3 }
 0x190   : > { %v1220_v61 = vpop.eup %1219  ;;  %v712_v10 = vadd.f32 %v681_v29, %v570_v20  ;;  %v849_v34 = vpop.permute.xlu1 %848  ;;  %v1628_v20 = vld [vmem:[%s1683_s6 + $0x2] ss:$0 sm:$0xff] }
 0x191   : > { %v1222_v43 = vpop.eup %1221  ;;  %912 = vst.msk [vmem:[%s1574_s14 + $0x28] sm:$0xff] %vm580_vm0, %v1220_v61  ;;  %1227 = vtanh.f32 %v713_v48  ;;  %v773_v53 = vmul.f32 %v1220_v61, %v1124_v46  ;;  %v750_v35 = vpop.xlane.xlu0 %749  ;;  %v867_v48 = vadd.f32 %v849_v34, %v810_v38  ;;  %v876_v2 = vadd.f32 %v1628_v20, %v863_v40 }
 0x192   : > { %911 = vst.msk [vmem:[%s1574_s14 + $0x20] sm:$0xff] %vm580_vm0, %v1222_v43  ;;  %1229 = vtanh.f32 %v712_v10  ;;  %v772_v58 = vmul.f32 %v1222_v43, %v1124_v46  ;;  %v866_v29 = vadd.f32 %v847_v28, %v809_v18  ;;  %v875_v61 = vadd.f32 %v1628_v20, %v862_v42 }
 0x193   : > { %v791_v63 = vsel %vm580_vm0, %v773_v53, 0.0  ;;  %v865_v43 = vadd.f32 %v845_v31, %v808_v4  ;;  %v811_v28 = vmul.f32 %v1615_v36, %v1369_v6 }
 0x194   : > { %v788_v33 = vsel %vm580_vm0, %v772_v58, 0.0  ;;  %v744_v37 = vpop.xlane.xlu1 %743  ;;  %v879_v7 = vadd.f32 %v1628_v20, %v866_v29 }
 0x195   : > { %v756_v51 = vpop.xlane.xlu0 %755  ;;  %v878_v8 = vadd.f32 %v1628_v20, %v865_v43 }
 0x197   : > { %v1224_v44 = vpop.eup %1223 }
 0x198   : > { %v1226_v17 = vpop.eup %1225  ;;  %908 = vst.msk [vmem:[%s1574_s14 + $0x8] sm:$0xff] %vm580_vm0, %v1224_v44  ;;  %v769_v16 = vmul.f32 %v1224_v44, %v1124_v46  ;;  %v753_v41 = vpop.xlane.xlu1 %752  ;;  %v880_v44 = vadd.f32 %v1628_v20, %v867_v48 }
 0x199   : > { %907 = vst.msk [vmem:[%s1574_s14] sm:$0xff] %vm580_vm0, %v1226_v17  ;;  %v768_v19 = vmul.f32 %v1226_v17, %v1124_v46  ;;  %v1636_v10 = vpop.xlane.xlu0 %761  ;;  %v864_v17 = vadd.f32 %v843_v54, %v807_v5 }
 0x19a   : > { %v779_v52 = vsel %vm580_vm0, %v769_v16, 0.0  ;;  %v883_v16 = vadd.f32 %v875_v61, %v741_v30  ;;  %v812_v30 = vmul.f32 %v1615_v36, %v1398_v15 }
 0x19b   : > { %v1228_v27 = vpop.eup %1227  ;;  %v1169_v55 = vpop.f32.mrb[2].mxu1  ;;  %780 = vadd.xlane.f32.xlu0 %v779_v52  ;;  %v776_v57 = vsel %vm580_vm0, %v768_v19, 0.0 }
 0x19c   : > { %v1230_v59 = vpop.eup %1229  ;;  %910 = vst.msk [vmem:[%s1574_s14 + $0x18] sm:$0xff] %vm580_vm0, %v1228_v27  ;;  %v717_v60 = vadd.f32 %v1169_v55, %v575_v50  ;;  %v701_v62 = vpop.f32.mrb[3].mxu1  ;;  %777 = vadd.xlane.f32.xlu1 %v776_v57  ;;  %v771_v0 = vmul.f32 %v1228_v27, %v1124_v46  ;;  %v888_v27 = vadd.f32 %v880_v44, %v756_v51 }
 0x19d   : > { %909 = vst.msk [vmem:[%s1574_s14 + $0x10] sm:$0xff] %vm580_vm0, %v1230_v59  ;;  %v716_v45 = vadd.f32 %v701_v62, %v574_v56  ;;  %v770_v1 = vmul.f32 %v1230_v59, %v1124_v46  ;;  %v1638_v3 = vpop.xlane.xlu1 %758  ;;  %v877_v56 = vadd.f32 %v1628_v20, %v864_v17  ;;  %v887_v57 = vadd.f32 %v879_v7, %v753_v41 }
 0x19e   : > { %1231 = vtanh.f32 %v717_v60  ;;  %v785_v9 = vsel %vm580_vm0, %v771_v0, 0.0 }
 0x19f   : > { %1233 = vtanh.f32 %v716_v45  ;;  %792 = vadd.xlane.f32.xlu0 %v791_v63  ;;  %v782_v11 = vsel %vm580_vm0, %v770_v1, 0.0  ;;  %v886_v63 = vadd.f32 %v878_v8, %v750_v35 }
 0x1a0   : > { %789 = vadd.xlane.f32.xlu1 %v788_v33  ;;  %v885_v33 = vadd.f32 %v877_v56, %v747_v32 }
 0x1a3   : > { %786 = vadd.xlane.f32.xlu0 %v785_v9 }
 0x1a4   : > { %783 = vadd.xlane.f32.xlu1 %v782_v11 }
 0x1a8   : > { %v1232_v12 = vpop.eup %1231 }
 0x1a9   : > { %v1234_v13 = vpop.eup %1233  ;;  %914 = vst.msk [vmem:[%s1574_s14 + $0x38] sm:$0xff] %vm580_vm0, %v1232_v12  ;;  %v775_v14 = vmul.f32 %v1232_v12, %v1124_v46 }
 0x1aa   : > { %913 = vst.msk [vmem:[%s1574_s14 + $0x30] sm:$0xff] %vm580_vm0, %v1234_v13  ;;  %v774_v49 = vmul.f32 %v1234_v13, %v1124_v46  ;;  %v884_v46 = vadd.f32 %v876_v2, %v744_v37 }
 0x1ab   : > { %v797_v21 = vsel %vm580_vm0, %v775_v14, 0.0 }
 0x1ac   : > { %798 = vadd.xlane.f32.xlu0 %v797_v21  ;;  %v794_v22 = vsel %vm580_vm0, %v774_v49, 0.0 }
 0x1ad   : > { %795 = vadd.xlane.f32.xlu1 %v794_v22 }
 0x1be   : > { %852 = vrot.lane.b32.xlu1 %v829_v23, %s1278_s26 }
 0x1c2   : > { %850 = vrot.lane.b32.xlu0 %v828_v24, %s1278_s26 }
 0x228   : > { %v781_v19 = vpop.xlane.xlu0 %780 }
 0x229   : > { %v892_v50 = vadd.f32 %v884_v46, %v781_v19  ;;  %v778_v52 = vpop.xlane.xlu1 %777 }
 0x22a   : > { %v891_v53 = vadd.f32 %v883_v16, %v778_v52 }
 0x22b   : > { %v1129_v55 = vmul.f32 -1.442695, %v892_v50 }
 0x22c   : > { %v1128_v58 = vmul.f32 -1.442695, %v891_v53  ;;  %v793_v59 = vpop.xlane.xlu0 %792 }
 0x22d   : > { %1235 = vpow2.f32 %v1129_v55  ;;  %v896_v60 = vadd.f32 %v888_v27, %v793_v59  ;;  %v790_v62 = vpop.xlane.xlu1 %789 }
 0x22e   : > { %1237 = vpow2.f32 %v1128_v58  ;;  %v895_v45 = vadd.f32 %v887_v57, %v790_v62 }
 0x22f   : > { %v1133_v0 = vmul.f32 -1.442695, %v896_v60 }
 0x230   : > { %v1132_v1 = vmul.f32 -1.442695, %v895_v45  ;;  %v787_v9 = vpop.xlane.xlu0 %786 }
 0x231   : > { %1239 = vpow2.f32 %v1133_v0  ;;  %v894_v11 = vadd.f32 %v886_v63, %v787_v9  ;;  %v784_v12 = vpop.xlane.xlu1 %783 }
 0x232   : > { %1241 = vpow2.f32 %v1132_v1  ;;  %v893_v13 = vadd.f32 %v885_v33, %v784_v12 }
 0x233   : > { %v1131_v14 = vmul.f32 -1.442695, %v894_v11 }
 0x234   : > { %v1130_v49 = vmul.f32 -1.442695, %v893_v13 }
 0x235   : > { %1243 = vpow2.f32 %v1131_v14 }
 0x236   : > { %1245 = vpow2.f32 %v1130_v49 }
 0x237   : > { %v1236_v21 = vpop.eup %1235 }
 0x238   : > { %v1238_v22 = vpop.eup %1237  ;;  %v940_v23 = vadd.f32 1.0, %v1236_v21 }
 0x239   : > { %v939_v24 = vadd.f32 1.0, %v1238_v22  ;;  %v799_v25 = vpop.xlane.xlu0 %798 }
 0x23a   : > { %1247 = vrcp.f32 %v940_v23  ;;  %v796_v26 = vpop.xlane.xlu1 %795 }
 0x23b   : > { %v1240_v54 = vpop.eup %1239  ;;  %1249 = vrcp.f32 %v939_v24 }
 0x23c   : > { %v1242_v31 = vpop.eup %1241  ;;  %v944_v32 = vadd.f32 1.0, %v1240_v54 }
 0x23d   : > { %v943_v34 = vadd.f32 1.0, %v1242_v31  ;;  %v851_v35 = vpop.permute.xlu0 %850 }
 0x23e   : > { %1251 = vrcp.f32 %v944_v32  ;;  %v868_v37 = vadd.f32 %v851_v35, %v811_v28  ;;  %v853_v47 = vpop.permute.xlu1 %852 }
 0x23f   : > { %v1244_v39 = vpop.eup %1243  ;;  %1253 = vrcp.f32 %v943_v34  ;;  %v869_v51 = vadd.f32 %v853_v47, %v812_v30 }
 0x240   : > { %v1246_v40 = vpop.eup %1245  ;;  %v942_v38 = vadd.f32 1.0, %v1244_v39  ;;  %v881_v6 = vadd.f32 %v1628_v20, %v868_v37 }
 0x241   : > { %v941_v41 = vadd.f32 1.0, %v1246_v40  ;;  %v882_v42 = vadd.f32 %v1628_v20, %v869_v51 }
 0x242   : > { %1255 = vrcp.f32 %v942_v38  ;;  %v889_v15 = vadd.f32 %v881_v6, %v1638_v3 }
 0x243   : > { %1257 = vrcp.f32 %v941_v41  ;;  %v890_v36 = vadd.f32 %v882_v42, %v1636_v10 }
 0x244   : > { %v1248_v18 = vpop.eup %1247  ;;  %v897_v4 = vadd.f32 %v889_v15, %v796_v26 }
 0x245   : > { %v1250_v20 = vpop.eup %1249  ;;  %965 = vst.msk [vmem:[%s1654_s24 + $0x8] sm:$0xff] %vm963_vm1, %v1248_v18  ;;  %v898_v48 = vadd.f32 %v890_v36, %v799_v25 }
 0x246   : > { %964 = vst.msk [vmem:[%s1654_s24] sm:$0xff] %vm963_vm1, %v1250_v20  ;;  %v1134_v2 = vmul.f32 -1.442695, %v897_v4 }
 0x247   : > { %v1135_v29 = vmul.f32 -1.442695, %v898_v48 }
 0x248   : > { %v1252_v5 = vpop.eup %1251  ;;  %1259 = vpow2.f32 %v1134_v2 }
 0x249   : > { %v1254_v61 = vpop.eup %1253  ;;  %969 = vst.msk [vmem:[%s1654_s24 + $0x28] sm:$0xff] %vm963_vm1, %v1252_v5  ;;  %1261 = vpow2.f32 %v1135_v29 }
 0x24a   : > { %968 = vst.msk [vmem:[%s1654_s24 + $0x20] sm:$0xff] %vm963_vm1, %v1254_v61 }
 0x24c   : > { %v1256_v10 = vpop.eup %1255 }
 0x24d   : > { %v1258_v3 = vpop.eup %1257  ;;  %967 = vst.msk [vmem:[%s1654_s24 + $0x18] sm:$0xff] %vm963_vm1, %v1256_v10 }
 0x24e   : > { %966 = vst.msk [vmem:[%s1654_s24 + $0x10] sm:$0xff] %vm963_vm1, %v1258_v3 }
 0x252   : > { %v1260_v43 = vpop.eup %1259 }
 0x253   : > { %v1262_v44 = vpop.eup %1261  ;;  %v945_v46 = vadd.f32 1.0, %v1260_v43 }
 0x254   : > { %v946_v17 = vadd.f32 1.0, %v1262_v44 }
 0x255   : > { %1263 = vrcp.f32 %v945_v46 }
 0x256   : > { %1265 = vrcp.f32 %v946_v17 }
 0x25f   : > { %v1264_v16 = vpop.eup %1263 }
 0x260   : > { %v1266_v7 = vpop.eup %1265  ;;  %970 = vst.msk [vmem:[%s1654_s24 + $0x30] sm:$0xff] %vm963_vm1, %v1264_v16 }
 0x261   : > { %971 = vst.msk [vmem:[%s1654_s24 + $0x38] sm:$0xff] %vm963_vm1, %v1266_v7 }
 0x262 PF: > { %s21_s13 = sadd.s32 1, %s1273_s13  }
 0x263   : > { %p18_p4 = scmp.ge.s32.totalorder %s21_s13, 6  }
 0x265   :  { %20 = sbr.rel (!%p18_p4) target bundleno = 1 (0x1), region = 106 }

</bundles_post_ra>
